<compile_context>
chip_gen: v7x
topology: tpu7x:2x2x1
jax: 0.10.0
libtpu: 0.0.40
codegen_flags: <defaults>
</compile_context>

<pallas_src>
import functools
import math

import jax
import jax.numpy as jnp
from jax import lax
from jax.experimental import pallas as pl
from jax.experimental.pallas import tpu as pltpu


_SQRT_2_OVER_PI = math.sqrt(2.0 / math.pi)


def _gelu_tanh(x):
    # TODO(synk): nn.GELU() default is the exact erf form; the tanh
    # approximation (max abs diff ~1e-3) is used since erf has no guaranteed
    # Mosaic lowering.
    return 0.5 * x * (1.0 + jnp.tanh(_SQRT_2_OVER_PI * (x + 0.044715 * x * x * x)))


def _sigmoid(x):
    return 1.0 / (1.0 + jnp.exp(-x))


def _gmlp_kernel(x_ref, w1_ref, b1_ref, wd_ref, bd_ref, w2_ref, b2_ref, o_ref,
                 *, H, W):
    N = H * W
    C = w1_ref.shape[1]                                       # Ch_p (lane-padded)

    # ---- fc1 (+ bias): MXU matmul with bf16 operands, f32 accumulation ----
    h = jnp.dot(x_ref[...], w1_ref[...],
                preferred_element_type=jnp.float32)           # (N, Ch_p) f32
    h = h + b1_ref[...]

    # ---- GELU + sigmoid gate (f32 on VPU/EUP) ----
    h = _gelu_tanh(h)
    a = h * _sigmoid(h)                                       # (N, Ch_p)

    # ---- depthwise 3x3 conv, stride 1, pad 1; channels live in the lane dim.
    # Horizontal (column) boundary masks are computed once and folded into
    # three column-shifted copies of `a`; the vertical (row) boundary is
    # handled by zero-row padding, so every tap is a static slice + one
    # broadcasted multiply-add.
    col = lax.broadcasted_iota(jnp.int32, (N, 1), 0) % W       # j index per token
    mask_l = (col > 0).astype(jnp.float32)                     # (N, 1)
    mask_r = (col < W - 1).astype(jnp.float32)                 # (N, 1)

    zero1 = jnp.zeros((1, C), jnp.float32)
    ap1 = jnp.concatenate([zero1, a, zero1], axis=0)           # (N + 2, C)
    b_m1 = ap1[0:N, :] * mask_l                                # a[n-1], col-masked
    b_p1 = ap1[2:N + 2, :] * mask_r                            # a[n+1], col-masked
    col_shifted = (b_m1, a, b_p1)                              # dc = -1, 0, +1

    wd = wd_ref[...]                                           # (9, Ch_p) f32
    zeroW = jnp.zeros((W, C), jnp.float32)
    conv = jnp.zeros_like(a)
    for dc in range(3):
        bp = jnp.concatenate([zeroW, col_shifted[dc], zeroW], axis=0)  # (N+2W, C)
        for dr in range(3):
            k = dr * 3 + dc                                    # tap (kh=dr, kw=dc)
            conv = conv + bp[dr * W:dr * W + N, :] * wd[k:k + 1, :]
    conv = conv + bd_ref[...]

    # ---- fc2 (+ bias) ----
    out = jnp.dot(conv.astype(jnp.bfloat16), w2_ref[...],
                  preferred_element_type=jnp.float32)          # (N, Cout_p)
    o_ref[...] = (out + b2_ref[...]).astype(o_ref.dtype)


def _round_up(v, m):
    return (v + m - 1) // m * m


def gmlp_encoder(x, w1, b1, wd, bd, w2, b2, *, H, W):
    """Fused GMLP_Encoder forward.

    x : (B, N, Cin) float32, N = H*W
    w1: (Ch, Cin)  fc1 weight      b1: (Ch,)
    wd: (Ch, 1, 3, 3) depthwise conv weight   bd: (Ch,)
    w2: (Cout, Ch) fc2 weight      b2: (Cout,)
    returns (B, N, Cout) float32
    """
    B, N, Cin = x.shape
    Ch = w1.shape[0]
    Cout = w2.shape[0]
    assert N == H * W, "sequence length must equal H*W"
    assert N % 8 == 0, "H*W must be a multiple of 8 (sublane tiling)"

    LANE = 128
    Cin_p = _round_up(Cin, LANE)
    Ch_p = _round_up(Ch, LANE)
    Cout_p = _round_up(Cout, LANE)

    # Zero-padded, lane-dense operands.  Padded rows/cols are zero so they
    # contribute nothing; the extra output columns are sliced off below.
    # x and the matmul weights are pre-cast to bf16 (identical numerics to an
    # in-kernel cast, but half the HBM->VMEM DMA bytes for the streamed input).
    x2 = jnp.pad(x.reshape(B * N, Cin).astype(jnp.float32),
                 ((0, 0), (0, Cin_p - Cin))).astype(jnp.bfloat16)
    w1p = jnp.pad(w1.T, ((0, Cin_p - Cin), (0, Ch_p - Ch))).astype(jnp.bfloat16)
    b1p = jnp.pad(b1, (0, Ch_p - Ch)).reshape(1, Ch_p).astype(jnp.float32)
    wdp = jnp.pad(wd.reshape(Ch, 9).T,
                  ((0, 0), (0, Ch_p - Ch))).astype(jnp.float32)      # (9, Ch_p)
    bdp = jnp.pad(bd, (0, Ch_p - Ch)).reshape(1, Ch_p).astype(jnp.float32)
    w2p = jnp.pad(w2.T, ((0, Ch_p - Ch), (0, Cout_p - Cout))).astype(jnp.bfloat16)
    b2p = jnp.pad(b2, (0, Cout_p - Cout)).reshape(1, Cout_p).astype(jnp.float32)

    out = pl.pallas_call(
        functools.partial(_gmlp_kernel, H=H, W=W),
        out_shape=jax.ShapeDtypeStruct((B * N, Cout_p), jnp.float32),
        grid=(B,),
        in_specs=[
            pl.BlockSpec((N, Cin_p), lambda b: (b, 0)),       # x: one image / step
            pl.BlockSpec((Cin_p, Ch_p), lambda b: (0, 0)),    # fc1 weight (resident)
            pl.BlockSpec((1, Ch_p), lambda b: (0, 0)),        # fc1 bias
            pl.BlockSpec((9, Ch_p), lambda b: (0, 0)),        # dwconv taps
            pl.BlockSpec((1, Ch_p), lambda b: (0, 0)),        # dwconv bias
            pl.BlockSpec((Ch_p, Cout_p), lambda b: (0, 0)),   # fc2 weight (resident)
            pl.BlockSpec((1, Cout_p), lambda b: (0, 0)),      # fc2 bias
        ],
        out_specs=pl.BlockSpec((N, Cout_p), lambda b: (b, 0)),
        compiler_params=pltpu.CompilerParams(
            dimension_semantics=("parallel",)),
    )(x2, w1p, b1p, wdp, bdp, w2p, b2p)

    return out[:, :Cout].reshape(B, N, Cout)


def _reference(x, w1, b1, wd, bd, w2, b2, H, W):
    """Pure-JAX f32 reference with identical semantics (for validation)."""
    B, N, _ = x.shape
    Ch = w1.shape[0]
    h = x @ w1.T + b1
    h = _gelu_tanh(h)
    a = h * _sigmoid(h)
    img = a.transpose(0, 2, 1).reshape(B, Ch, H, W)
    imgp = jnp.pad(img, ((0, 0), (0, 0), (1, 1), (1, 1)))
    conv = jnp.zeros_like(img)
    for kh in range(3):
        for kw in range(3):
            conv = conv + (imgp[:, :, kh:kh + H, kw:kw + W]
                           * wd[:, 0, kh, kw][None, :, None, None])
    conv = conv + bd[None, :, None, None]
    a = conv.reshape(B, Ch, N).transpose(0, 2, 1)
    return a @ w2.T + b2


if __name__ == "__main__":
    # Small shapes consistent with the module: x is (B, N, C) with N = H*W.
    B, H, W = 2, 4, 4
    N = H * W                                      # 16 tokens
    in_features, hidden_features, out_features = 32, 64, 32

    key = jax.random.PRNGKey(0)
    kx, k1, kd, k2 = jax.random.split(key, 4)

    x = jax.random.normal(kx, (B, N, in_features), dtype=jnp.float32)

    # _init_weights: Linear ~ trunc_normal(std=0.02), bias 0;
    # depthwise Conv2d ~ normal(0, sqrt(2/fan_out)), fan_out = 3*3*Ch//Ch = 9.
    w1 = 0.02 * jax.random.normal(k1, (hidden_features, in_features), jnp.float32)
    b1 = jnp.zeros((hidden_features,), jnp.float32)
    wd = math.sqrt(2.0 / 9.0) * jax.random.normal(
        kd, (hidden_features, 1, 3, 3), jnp.float32)
    bd = jnp.zeros((hidden_features,), jnp.float32)
    w2 = 0.02 * jax.random.normal(k2, (out_features, hidden_features), jnp.float32)
    b2 = jnp.zeros((out_features,), jnp.float32)

    out = gmlp_encoder(x, w1, b1, wd, bd, w2, b2, H=H, W=W)
    out = jax.block_until_ready(out)

    assert out.shape == (B, N, out_features)

    ref = _reference(x, w1, b1, wd, bd, w2, b2, H, W)
    max_err = float(jnp.max(jnp.abs(out - ref)))
    assert jnp.allclose(out, ref, atol=5e-3, rtol=5e-2), max_err

    print("KERNEL_OK")
</pallas_src>

<mosaic_0001>
module attributes {stable_mosaic.version = 11 : i64} {
  func.func @_gmlp_kernel(%arg0: i32, %arg1: memref<16x128xbf16, #tpu.memory_space<vmem>>, %arg2: memref<128x128xbf16, #tpu.memory_space<vmem>>, %arg3: memref<1x128xf32, #tpu.memory_space<vmem>>, %arg4: memref<9x128xf32, #tpu.memory_space<vmem>>, %arg5: memref<1x128xf32, #tpu.memory_space<vmem>>, %arg6: memref<128x128xbf16, #tpu.memory_space<vmem>>, %arg7: memref<1x128xf32, #tpu.memory_space<vmem>>, %arg8: memref<16x128xf32, #tpu.memory_space<vmem>>) attributes {dimension_semantics = [#tpu.dimension_semantics<parallel>], iteration_bounds = array<i64: 2>, scalar_prefetch = 0 : i64, scratch_operands = 0 : i64, tpu.core_type = #tpu.core_type<tc>, window_params = [{transform_indices = @transform_0, window_bounds = array<i64: 16, 128>}, {pipeline_mode = #tpu.pipeline_mode<synchronous>, transform_indices = @transform_1, window_bounds = array<i64: 128, 128>}, {pipeline_mode = #tpu.pipeline_mode<synchronous>, transform_indices = @transform_2, window_bounds = array<i64: 1, 128>}, {pipeline_mode = #tpu.pipeline_mode<synchronous>, transform_indices = @transform_3, window_bounds = array<i64: 9, 128>}, {pipeline_mode = #tpu.pipeline_mode<synchronous>, transform_indices = @transform_4, window_bounds = array<i64: 1, 128>}, {pipeline_mode = #tpu.pipeline_mode<synchronous>, transform_indices = @transform_5, window_bounds = array<i64: 128, 128>}, {pipeline_mode = #tpu.pipeline_mode<synchronous>, transform_indices = @transform_6, window_bounds = array<i64: 1, 128>}, {transform_indices = @transform_7, window_bounds = array<i64: 16, 128>}]} {
    %c0 = arith.constant 0 : index
    %c0_0 = arith.constant 0 : index
    %0 = vector.load %arg1[%c0, %c0_0] : memref<16x128xbf16, #tpu.memory_space<vmem>>, vector<16x128xbf16>
    %c0_1 = arith.constant 0 : index
    %c0_2 = arith.constant 0 : index
    %1 = vector.load %arg2[%c0_1, %c0_2] : memref<128x128xbf16, #tpu.memory_space<vmem>>, vector<128x128xbf16>
    %cst = arith.constant dense<0.000000e+00> : vector<16x128xf32>
    %2 = tpu.matmul %0, %1, %cst {dimension_numbers = #tpu.dot_dimension_numbers<[1], [0], [0], [1], [0, 0, 1, 1], [], []>} : vector<16x128xbf16>, vector<128x128xbf16>, vector<16x128xf32> -> vector<16x128xf32>
    %c0_3 = arith.constant 0 : index
    %c0_4 = arith.constant 0 : index
    %3 = vector.load %arg3[%c0_3, %c0_4] : memref<1x128xf32, #tpu.memory_space<vmem>>, vector<1x128xf32>
    %4 = vector.broadcast %3 : vector<1x128xf32> to vector<16x128xf32>
    %5 = arith.addf %2, %4 : vector<16x128xf32>
    %cst_5 = arith.constant 5.000000e-01 : f32
    %6 = vector.broadcast %cst_5 : f32 to vector<16x128xf32>
    %7 = arith.mulf %6, %5 : vector<16x128xf32>
    %cst_6 = arith.constant 4.471500e-02 : f32
    %8 = vector.broadcast %cst_6 : f32 to vector<16x128xf32>
    %9 = arith.mulf %8, %5 : vector<16x128xf32>
    %10 = arith.mulf %9, %5 : vector<16x128xf32>
    %11 = arith.mulf %10, %5 : vector<16x128xf32>
    %12 = arith.addf %5, %11 : vector<16x128xf32>
    %cst_7 = arith.constant 0.797884583 : f32
    %13 = vector.broadcast %cst_7 : f32 to vector<16x128xf32>
    %14 = arith.mulf %13, %12 : vector<16x128xf32>
    %15 = math.tanh %14 : vector<16x128xf32>
    %cst_8 = arith.constant 1.000000e+00 : f32
    %16 = vector.broadcast %cst_8 : f32 to vector<16x128xf32>
    %17 = arith.addf %16, %15 : vector<16x128xf32>
    %18 = arith.mulf %7, %17 : vector<16x128xf32>
    %cst_9 = arith.constant 0.000000e+00 : f32
    %19 = vector.broadcast %cst_9 : f32 to vector<16x128xf32>
    %20 = arith.subf %19, %18 : vector<16x128xf32>
    %21 = math.exp %20 : vector<16x128xf32>
    %cst_10 = arith.constant 1.000000e+00 : f32
    %22 = vector.broadcast %cst_10 : f32 to vector<16x128xf32>
    %23 = arith.addf %22, %21 : vector<16x128xf32>
    %cst_11 = arith.constant 1.000000e+00 : f32
    %24 = vector.broadcast %cst_11 : f32 to vector<16x128xf32>
    %25 = arith.divf %24, %23 : vector<16x128xf32>
    %26 = arith.mulf %18, %25 : vector<16x128xf32>
    %27 = tpu.iota {dimensions = array<i32: 0>} : vector<16x1xi32>
    %c4_i32 = arith.constant 4 : i32
    %c0_i32 = arith.constant 0 : i32
    %28 = arith.cmpi eq, %c4_i32, %c0_i32 : i32
    %c1_i32 = arith.constant 1 : i32
    %29 = arith.select %28, %c1_i32, %c4_i32 : i32
    %30 = vector.broadcast %29 : i32 to vector<16x1xi32>
    %31 = arith.remsi %27, %30 : vector<16x1xi32>
    %c0_i32_12 = arith.constant 0 : i32
    %32 = vector.broadcast %c0_i32_12 : i32 to vector<16x1xi32>
    %33 = arith.cmpi ne, %31, %32 : vector<16x1xi32>
    %c0_i32_13 = arith.constant 0 : i32
    %34 = vector.broadcast %c0_i32_13 : i32 to vector<16x1xi32>
    %35 = arith.cmpi slt, %31, %34 : vector<16x1xi32>
    %c0_i32_14 = arith.constant 0 : i32
    %36 = arith.cmpi slt, %29, %c0_i32_14 : i32
    %37 = vector.broadcast %36 : i1 to vector<16x1xi1>
    %38 = vector.broadcast %37 : vector<16x1xi1> to vector<16x1xi1>
    %39 = arith.xori %35, %38 : vector<16x1xi1>
    %40 = arith.andi %39, %33 : vector<16x1xi1>
    %41 = vector.broadcast %29 : i32 to vector<16x1xi32>
    %42 = arith.addi %31, %41 : vector<16x1xi32>
    %43 = arith.select %40, %42, %31 : vector<16x1xi1>, vector<16x1xi32>
    %c0_i32_15 = arith.constant 0 : i32
    %44 = vector.broadcast %c0_i32_15 : i32 to vector<16x1xi32>
    %45 = arith.cmpi sgt, %43, %44 : vector<16x1xi32>
    %46 = arith.extui %45 : vector<16x1xi1> to vector<16x1xi32>
    %47 = arith.sitofp %46 : vector<16x1xi32> to vector<16x1xf32>
    %c3_i32 = arith.constant 3 : i32
    %48 = vector.broadcast %c3_i32 : i32 to vector<16x1xi32>
    %49 = arith.cmpi slt, %43, %48 : vector<16x1xi32>
    %50 = arith.extui %49 : vector<16x1xi1> to vector<16x1xi32>
    %51 = arith.sitofp %50 : vector<16x1xi32> to vector<16x1xf32>
    %cst_16 = arith.constant 0.000000e+00 : f32
    %52 = vector.broadcast %cst_16 : f32 to vector<1x128xf32>
    %53 = tpu.concatenate %52, %26, %52 in 0 : vector<1x128xf32>, vector<16x128xf32>, vector<1x128xf32> -> vector<18x128xf32>
    %54 = vector.extract_strided_slice %53 {offsets = [0, 0], sizes = [16, 128], strides = [1, 1]} : vector<18x128xf32> to vector<16x128xf32>
    %55 = vector.broadcast %47 : vector<16x1xf32> to vector<16x128xf32>
    %56 = arith.mulf %54, %55 : vector<16x128xf32>
    %57 = vector.extract_strided_slice %53 {offsets = [2, 0], sizes = [16, 128], strides = [1, 1]} : vector<18x128xf32> to vector<16x128xf32>
    %58 = vector.broadcast %51 : vector<16x1xf32> to vector<16x128xf32>
    %59 = arith.mulf %57, %58 : vector<16x128xf32>
    %c0_17 = arith.constant 0 : index
    %c0_18 = arith.constant 0 : index
    %60 = vector.load %arg4[%c0_17, %c0_18] : memref<9x128xf32, #tpu.memory_space<vmem>>, vector<9x128xf32>
    %cst_19 = arith.constant 0.000000e+00 : f32
    %61 = vector.broadcast %cst_19 : f32 to vector<4x128xf32>
    %cst_20 = arith.constant 0.000000e+00 : f32
    %62 = vector.broadcast %cst_20 : f32 to vector<16x128xf32>
    %63 = tpu.concatenate %61, %56, %61 in 0 : vector<4x128xf32>, vector<16x128xf32>, vector<4x128xf32> -> vector<24x128xf32>
    %64 = vector.extract_strided_slice %63 {offsets = [0, 0], sizes = [16, 128], strides = [1, 1]} : vector<24x128xf32> to vector<16x128xf32>
    %65 = vector.extract_strided_slice %60 {offsets = [0, 0], sizes = [1, 128], strides = [1, 1]} : vector<9x128xf32> to vector<1x128xf32>
    %66 = vector.broadcast %65 : vector<1x128xf32> to vector<16x128xf32>
    %67 = arith.mulf %64, %66 : vector<16x128xf32>
    %68 = arith.addf %62, %67 : vector<16x128xf32>
    %69 = vector.extract_strided_slice %63 {offsets = [4, 0], sizes = [16, 128], strides = [1, 1]} : vector<24x128xf32> to vector<16x128xf32>
    %70 = vector.extract_strided_slice %60 {offsets = [3, 0], sizes = [1, 128], strides = [1, 1]} : vector<9x128xf32> to vector<1x128xf32>
    %71 = vector.broadcast %70 : vector<1x128xf32> to vector<16x128xf32>
    %72 = arith.mulf %69, %71 : vector<16x128xf32>
    %73 = arith.addf %68, %72 : vector<16x128xf32>
    %74 = vector.extract_strided_slice %63 {offsets = [8, 0], sizes = [16, 128], strides = [1, 1]} : vector<24x128xf32> to vector<16x128xf32>
    %75 = vector.extract_strided_slice %60 {offsets = [6, 0], sizes = [1, 128], strides = [1, 1]} : vector<9x128xf32> to vector<1x128xf32>
    %76 = vector.broadcast %75 : vector<1x128xf32> to vector<16x128xf32>
    %77 = arith.mulf %74, %76 : vector<16x128xf32>
    %78 = arith.addf %73, %77 : vector<16x128xf32>
    %79 = tpu.concatenate %61, %26, %61 in 0 : vector<4x128xf32>, vector<16x128xf32>, vector<4x128xf32> -> vector<24x128xf32>
    %80 = vector.extract_strided_slice %79 {offsets = [0, 0], sizes = [16, 128], strides = [1, 1]} : vector<24x128xf32> to vector<16x128xf32>
    %81 = vector.extract_strided_slice %60 {offsets = [1, 0], sizes = [1, 128], strides = [1, 1]} : vector<9x128xf32> to vector<1x128xf32>
    %82 = vector.broadcast %81 : vector<1x128xf32> to vector<16x128xf32>
    %83 = arith.mulf %80, %82 : vector<16x128xf32>
    %84 = arith.addf %78, %83 : vector<16x128xf32>
    %85 = vector.extract_strided_slice %79 {offsets = [4, 0], sizes = [16, 128], strides = [1, 1]} : vector<24x128xf32> to vector<16x128xf32>
    %86 = vector.extract_strided_slice %60 {offsets = [4, 0], sizes = [1, 128], strides = [1, 1]} : vector<9x128xf32> to vector<1x128xf32>
    %87 = vector.broadcast %86 : vector<1x128xf32> to vector<16x128xf32>
    %88 = arith.mulf %85, %87 : vector<16x128xf32>
    %89 = arith.addf %84, %88 : vector<16x128xf32>
    %90 = vector.extract_strided_slice %79 {offsets = [8, 0], sizes = [16, 128], strides = [1, 1]} : vector<24x128xf32> to vector<16x128xf32>
    %91 = vector.extract_strided_slice %60 {offsets = [7, 0], sizes = [1, 128], strides = [1, 1]} : vector<9x128xf32> to vector<1x128xf32>
    %92 = vector.broadcast %91 : vector<1x128xf32> to vector<16x128xf32>
    %93 = arith.mulf %90, %92 : vector<16x128xf32>
    %94 = arith.addf %89, %93 : vector<16x128xf32>
    %95 = tpu.concatenate %61, %59, %61 in 0 : vector<4x128xf32>, vector<16x128xf32>, vector<4x128xf32> -> vector<24x128xf32>
    %96 = vector.extract_strided_slice %95 {offsets = [0, 0], sizes = [16, 128], strides = [1, 1]} : vector<24x128xf32> to vector<16x128xf32>
    %97 = vector.extract_strided_slice %60 {offsets = [2, 0], sizes = [1, 128], strides = [1, 1]} : vector<9x128xf32> to vector<1x128xf32>
    %98 = vector.broadcast %97 : vector<1x128xf32> to vector<16x128xf32>
    %99 = arith.mulf %96, %98 : vector<16x128xf32>
    %100 = arith.addf %94, %99 : vector<16x128xf32>
    %101 = vector.extract_strided_slice %95 {offsets = [4, 0], sizes = [16, 128], strides = [1, 1]} : vector<24x128xf32> to vector<16x128xf32>
    %102 = vector.extract_strided_slice %60 {offsets = [5, 0], sizes = [1, 128], strides = [1, 1]} : vector<9x128xf32> to vector<1x128xf32>
    %103 = vector.broadcast %102 : vector<1x128xf32> to vector<16x128xf32>
    %104 = arith.mulf %101, %103 : vector<16x128xf32>
    %105 = arith.addf %100, %104 : vector<16x128xf32>
    %106 = vector.extract_strided_slice %95 {offsets = [8, 0], sizes = [16, 128], strides = [1, 1]} : vector<24x128xf32> to vector<16x128xf32>
    %107 = vector.extract_strided_slice %60 {offsets = [8, 0], sizes = [1, 128], strides = [1, 1]} : vector<9x128xf32> to vector<1x128xf32>
    %108 = vector.broadcast %107 : vector<1x128xf32> to vector<16x128xf32>
    %109 = arith.mulf %106, %108 : vector<16x128xf32>
    %110 = arith.addf %105, %109 : vector<16x128xf32>
    %c0_21 = arith.constant 0 : index
    %c0_22 = arith.constant 0 : index
    %111 = vector.load %arg5[%c0_21, %c0_22] : memref<1x128xf32, #tpu.memory_space<vmem>>, vector<1x128xf32>
    %112 = vector.broadcast %111 : vector<1x128xf32> to vector<16x128xf32>
    %113 = arith.addf %110, %112 : vector<16x128xf32>
    %114 = arith.truncf %113 : vector<16x128xf32> to vector<16x128xbf16>
    %c0_23 = arith.constant 0 : index
    %c0_24 = arith.constant 0 : index
    %115 = vector.load %arg6[%c0_23, %c0_24] : memref<128x128xbf16, #tpu.memory_space<vmem>>, vector<128x128xbf16>
    %cst_25 = arith.constant dense<0.000000e+00> : vector<16x128xf32>
    %116 = tpu.matmul %114, %115, %cst_25 {dimension_numbers = #tpu.dot_dimension_numbers<[1], [0], [0], [1], [0, 0, 1, 1], [], []>} : vector<16x128xbf16>, vector<128x128xbf16>, vector<16x128xf32> -> vector<16x128xf32>
    %c0_26 = arith.constant 0 : index
    %c0_27 = arith.constant 0 : index
    %117 = vector.load %arg7[%c0_26, %c0_27] : memref<1x128xf32, #tpu.memory_space<vmem>>, vector<1x128xf32>
    %118 = vector.broadcast %117 : vector<1x128xf32> to vector<16x128xf32>
    %119 = arith.addf %116, %118 : vector<16x128xf32>
    %c0_28 = arith.constant 0 : index
    %c0_29 = arith.constant 0 : index
    %120 = vector.load %arg8[%c0_28, %c0_29] : memref<16x128xf32, #tpu.memory_space<vmem>>, vector<16x128xf32>
    tpu.vector_store %arg8[%c0_28, %c0_29], %119 {strides = array<i32>} : memref<16x128xf32, #tpu.memory_space<vmem>>, vector<16x128xf32>,
    return
  }
  func.func @transform_0(%arg0: i32) -> (i32, i32) {
    %c0_i32 = arith.constant 0 : i32
    %c0_i32_0 = arith.constant 0 : i32
    return %arg0, %c0_i32 : i32, i32
  }
  func.func @transform_1(%arg0: i32) -> (i32, i32) {
    %c0_i32 = arith.constant 0 : i32
    %c0_i32_0 = arith.constant 0 : i32
    %c0_i32_1 = arith.constant 0 : i32
    return %c0_i32, %c0_i32_0 : i32, i32
  }
  func.func @transform_2(%arg0: i32) -> (i32, i32) {
    %c0_i32 = arith.constant 0 : i32
    %c0_i32_0 = arith.constant 0 : i32
    %c0_i32_1 = arith.constant 0 : i32
    return %c0_i32, %c0_i32_0 : i32, i32
  }
  func.func @transform_3(%arg0: i32) -> (i32, i32) {
    %c0_i32 = arith.constant 0 : i32
    %c0_i32_0 = arith.constant 0 : i32
    %c0_i32_1 = arith.constant 0 : i32
    return %c0_i32, %c0_i32_0 : i32, i32
  }
  func.func @transform_4(%arg0: i32) -> (i32, i32) {
    %c0_i32 = arith.constant 0 : i32
    %c0_i32_0 = arith.constant 0 : i32
    %c0_i32_1 = arith.constant 0 : i32
    return %c0_i32, %c0_i32_0 : i32, i32
  }
  func.func @transform_5(%arg0: i32) -> (i32, i32) {
    %c0_i32 = arith.constant 0 : i32
    %c0_i32_0 = arith.constant 0 : i32
    %c0_i32_1 = arith.constant 0 : i32
    return %c0_i32, %c0_i32_0 : i32, i32
  }
  func.func @transform_6(%arg0: i32) -> (i32, i32) {
    %c0_i32 = arith.constant 0 : i32
    %c0_i32_0 = arith.constant 0 : i32
    %c0_i32_1 = arith.constant 0 : i32
    return %c0_i32, %c0_i32_0 : i32, i32
  }
  func.func @transform_7(%arg0: i32) -> (i32, i32) {
    %c0_i32 = arith.constant 0 : i32
    %c0_i32_0 = arith.constant 0 : i32
    return %arg0, %c0_i32 : i32, i32
  }
}

</mosaic_0001>

<bundles_post_ra>
// kernel: tpu_custom_call.1
= control target key start
LH: loop header
LB: loop body
LE: loop exit
PB: predicated region body
PF: predicated region fallthrough
CT: control target
= control target key end

     0   :  { %s1747_s0 = inlined_call_operand.hbm [shape: bf16[32,128], index: 0, kind: input, shape index: {}]   ;;  %s1748_s1 = inlined_call_operand.hbm [shape: bf16[128,128], index: 1, kind: input, shape index: {}]   ;;  %s1749_s2 = inlined_call_operand.vmem [shape: f32[1,128], index: 2, kind: input, shape index: {}]   ;;  %s1750_s3 = inlined_call_operand.hbm [shape: f32[9,128], index: 3, kind: input, shape index: {}]   ;;  %s1751_s4 = inlined_call_operand.vmem [shape: f32[1,128], index: 4, kind: input, shape index: {}]   ;;  %s1752_s5 = inlined_call_operand.hbm [shape: bf16[128,128], index: 5, kind: input, shape index: {}]   ;;  %s1753_s6 = inlined_call_operand.vmem [shape: f32[1,128], index: 6, kind: input, shape index: {}]   ;;  %s1754_s7 = inlined_call_operand.hbm [shape: f32[32,128], index: 7, kind: output, shape index: {}]  }
   0x1   :  { %1763 = sst [smem:[#allocation16_spill]] %s1748_s1 }
   0x2   :  { %12 = vsyncpa [#allocation3], 0 }
   0x3   :  { %14 = vsyncpa [#allocation3 + $0x1], 0 }
   0x4   :  { %15 = vsyncpa [#allocation6], 0 }
   0x5   :  { %16 = vsyncpa [#allocation9], 0 }
   0x6   :  { %17 = vsyncpa [#allocation4], 0 }
   0x7   :  { %19 = vsyncpa [#allocation4 + $0x1], 0  ;;  %s1401_s24 = smov 0   ;;  %s1403_s25 = smov 0  }
   0x8   :  { %s1405_s26 = smov 0   ;;  %s1407_s27 = smov 0  }
   0x9 LB: > { %s1422_s28 = sadd.s32 4294967295, %s1346_s27   ;;  %s939_s29 = sadd.s32 4294967294, %s1346_s27   ;;  %s1346_s27 = sphi %s1407_s27, %s1788_s27   ;;  %s1342_s26 = sphi %s1405_s26, %s1787_s26   ;;  %s1338_s25 = sphi %s1403_s25, %s1786_s25   ;;  %s1334_s24 = sphi %s1401_s24, %s1785_s24  }
   0xa   : > { %p45_p0 = scmp.ne.s32.totalorder %s1338_s25, %s1334_s24  ;;  %p1755_p1 = scmp.eq.s32.totalorder %s1422_s28, 0 }
   0xb   : > { %p201_p3 = scmp.eq.s32.totalorder %s939_s29, 1  ;;  %p940_p5 = scmp.ge.s32.totalorder %s1346_s27, 1 }
   0xc   : > { %p1431_p4 = por %p1755_p1, %p45_p0  ;;  %p208_p7 = scmp.lt.s32.totalorder %s1346_s27, 3 }
   0xd   : > { %p1436_p6 = por %p201_p3, %p45_p0  ;;  %s1348_s10 = smov [#allocation5]  }
   0xe   : > { %s1764_s30 = scalar_select %p1431_p4, 1, 0 }
   0xf   : > { %s1765_s8 = scalar_select %p1436_p6, 1, 0 }
  0x10   : > { %p1441_p8 = pnand %p940_p5, %p208_p7  ;;  %s220_s11 = sshll.u32 %s1348_s10, 4  ;;  %s1445_s11 = int_to_ptr.vmem [resolvable:$true] %s220_s11 }
  0x11   : > { %1766 = sst [smem:[#allocation15_spill]] %s1765_s8  ;;  %s1349_s13 = smov [#allocation7]  }
  0x12   : > { %s1767_s9 = scalar_select %p1441_p8, 1, 0 }
  0x13   : > { %p1060_p9 = pneg %p1441_p8  ;;  %s236_s14 = sshll.u32 %s1349_s13, 4  ;;  %s1456_s14 = int_to_ptr.vmem [resolvable:$true] %s236_s14 }
  0x14   : > { %s1769_s1 = sld [smem:[#allocation16_spill]] }
  0x15   : > { %p1452_p11 = pnand %p1060_p9, %p1755_p1 }
  0x17   : > { %p1466_p13 = pneg %p1452_p11 }
  0x1a   : > { %s1158_s17 = scalar_lea.hbm %s1769_s1, 1024 }
  0x1b   : > { %p1159_p12 = scmp.ne.s32.totalorder %s1769_s1, %s1158_s17  ;;  %p1165_p5 = scmp.lt.u32.totalorder %s1158_s17, %s1769_s1 }
  0x1d   : > { %p1161_p0 = pnand %p1466_p13, %p1159_p12 }
  0x1f   : > { %p1162_p3 = pneg %p1161_p0 }
  0x21   : > { %p1167_p7 = pnand %p1165_p5, %p1162_p3 }
  0x23   : > { %1170 = shalt.err (!%p1167_p7)
}
  0x24   : > { %s1171_s23 = scalar_lea.vmem %s1445_s11, 1024  ;;  %p1179_p2 = scmp.lt.s32.totalorder %s1445_s11, %s1445_s11 }
  0x25   : > { %p1172_p9 = scmp.ne.s32.totalorder %s1445_s11, %s1171_s23  ;;  %p1180_p6 = scmp.lt.s32.totalorder %s1171_s23, %s1171_s23 }
  0x27   : > { %p1174_p10 = pnand %p1172_p9, %p1466_p13  ;;  %p1181_p12 = por %p1180_p6, %p1179_p2 }
  0x29   : > { %p1175_p1 = pneg %p1174_p10 }
  0x2b   : > { %p1182_p0 = pnand %p1181_p12, %p1175_p1 }
  0x2d   : > { %1185 = shalt.err (!%p1182_p0)
}
  0x2e   : > { %s1756_s29 = smov 64   ;;  %s1758_s10 = smov 4  }
  0x2f   : > { %1063 = dma.hbm_to_vmem [thread:$0]  (!%p1452_p11), %s1769_s1, 1024, %s1445_s11, [#allocation6], %s1756_s29, %s1756_s29, %s1758_s10  }
  0x30   : > { %s1186_s18 = scalar_lea.hbm %s1750_s3, 256 }
  0x31   : > { %p1187_p1 = scmp.ne.s32.totalorder %s1750_s3, %s1186_s18  ;;  %p1193_p10 = scmp.lt.u32.totalorder %s1186_s18, %s1750_s3 }
  0x33   : > { %p1189_p2 = pnand %p1187_p1, %p1466_p13 }
  0x35   : > { %p1190_p6 = pneg %p1189_p2 }
  0x37   : > { %p1195_p3 = pnand %p1193_p10, %p1190_p6 }
  0x39   : > { %1198 = shalt.err (!%p1195_p3)
}
  0x3a   : > { %s1199_s11 = scalar_lea.vmem %s1456_s14, 256  ;;  %p1207_p12 = scmp.lt.s32.totalorder %s1456_s14, %s1456_s14 }
  0x3b   : > { %p1200_p5 = scmp.ne.s32.totalorder %s1456_s14, %s1199_s11  ;;  %p1208_p0 = scmp.lt.s32.totalorder %s1199_s11, %s1199_s11 }
  0x3d   : > { %p1202_p7 = pnand %p1200_p5, %p1466_p13  ;;  %p1209_p1 = por %p1208_p0, %p1207_p12 }
  0x3f   : > { %p1203_p9 = pneg %p1202_p7 }
  0x41   : > { %p1210_p2 = pnand %p1209_p1, %p1203_p9 }
  0x43   : > { %1213 = shalt.err (!%p1210_p2)
}
  0x44   : > { %s1352_s13 = smov 128   ;;  %s1353_s15 = smov 8  }
  0x45   : > { %1066 = dma.hbm_to_vmem [thread:$0]  (!%p1452_p11), %s1750_s3, 256, %s1456_s14, [#allocation6], %s1352_s13, %s1352_s13, %s1353_s15  }
  0x46   : > { %s1354_s18 = smov [#allocation8]   ;;  %s1514_s21 = sadd.s32 1, %s1346_s27  }
  0x47   : > { %s252_s19 = sshll.u32 %s1354_s18, 4  ;;  %s1214_s11 = scalar_lea.hbm %s1752_s5, 1024  ;;  %s253_s19 = int_to_ptr.vmem [resolvable:$true] %s252_s19 }
  0x48   : > { %p1215_p6 = scmp.ne.s32.totalorder %s1752_s5, %s1214_s11  ;;  %p1221_p5 = scmp.lt.u32.totalorder %s1214_s11, %s1752_s5 }
  0x4a   : > { %p1217_p10 = pnand %p1215_p6, %p1466_p13 }
  0x4c   : > { %p1218_p3 = pneg %p1217_p10 }
  0x4e   : > { %p1223_p7 = pnand %p1221_p5, %p1218_p3 }
  0x50   : > { %1226 = shalt.err (!%p1223_p7)
}
  0x51   : > { %s1227_s14 = scalar_lea.vmem %s253_s19, 1024  ;;  %p1235_p1 = scmp.lt.s32.totalorder %s253_s19, %s253_s19 }
  0x52   : > { %p1228_p9 = scmp.ne.s32.totalorder %s253_s19, %s1227_s14  ;;  %p1236_p2 = scmp.lt.s32.totalorder %s1227_s14, %s1227_s14 }
  0x54   : > { %p1230_p12 = pnand %p1228_p9, %p1466_p13  ;;  %p1237_p4 = por %p1236_p2, %p1235_p1 }
  0x56   : > { %p1231_p0 = pneg %p1230_p12 }
  0x58   : > { %p1238_p8 = pnand %p1237_p4, %p1231_p0 }
  0x5a   : > { %1241 = shalt.err (!%p1238_p8)
}
  0x5b   : > { %s1771_s29 = smov 4   ;;  %s1772_s10 = smov 64  }
  0x5c   : > { %1069 = dma.hbm_to_vmem [thread:$0]  (!%p1452_p11), %s1752_s5, 1024, %s253_s19, [#allocation9], %s1772_s10, %s1772_s10, %s1771_s29  }
  0x5d   : > { %s29_s20 = ssub.s32 %s1346_s27, %s1514_s21  ;;  %s32_s12 = sadd.s32 1, %s1342_s26 }
  0x5e   : > { %p30_p4 = scmp.eq.s32.totalorder %s29_s20, 0  ;;  %p39_p8 = scmp.ne.s32.totalorder %s1342_s26, %s1338_s25 }
  0x5f   : > { %p40_p13 = scmp.eq.s32.totalorder %s1346_s27, 0  ;;  %p1081_p6 = scmp.lt.s32.totalorder %s1346_s27, 2 }
  0x60   : > { %s1545_s13 = scalar_select %p30_p4, %s1342_s26, %s32_s12  }
  0x61   : > { %p41_p10 = por %p40_p13, %p39_p8  ;;  %p1773_p3 = scmp.eq.s32.totalorder %s1422_s28, 1 }
  0x62   : > { %s269_s16 = sand.u32 1, %s1342_s26   ;;  %s984_s17 = sshll.u32 %s1346_s27, 7 }
  0x63   : > { %p1549_p5 = por %p1773_p3, %p39_p8  ;;  %s945_s18 = sshll.u32 %s269_s16, 3 }
  0x64   : > { %s1558_s19 = scalar_lea.hbm %s1747_s0, %s984_s17  ;;  %s273_s11 = scalar_lea.vmem [#allocation2], %s945_s18 }
  0x65   : > { %s280_s14 = sshll.u32 %s273_s11, 4  ;;  %p1560_p11 = pnand %p1081_p6, %p41_p10  ;;  %s1564_s14 = int_to_ptr.vmem [resolvable:$true] %s280_s14 }
  0x66   : > { %s1566_s8 = scalar_lea.sflag [#allocation3], %s269_s16  ;;  %s1242_s20 = scalar_lea.hbm %s1558_s19, 128 }
  0x67   : > { %p1243_p7 = scmp.ne.s32.totalorder %s1558_s19, %s1242_s20  ;;  %p1244_p9 = pneg %p1560_p11 }
  0x68   : > { %s1247_s18 = scalar_lea.hbm %s1747_s0, 256  ;;  %p1248_p1 = scmp.lt.u32.totalorder %s1558_s19, %s1747_s0 }
  0x69   : > { %p1245_p12 = pnand %p1244_p9, %p1243_p7  ;;  %p1249_p2 = scmp.lt.u32.totalorder %s1247_s18, %s1242_s20 }
  0x6a   : > { %p1251_p8 = scmp.lt.u32.totalorder %s1242_s20, %s1558_s19 }
  0x6b   : > { %p1246_p0 = pneg %p1245_p12  ;;  %p1250_p4 = por %p1249_p2, %p1248_p1 }
  0x6d   : > { %p1252_p13 = por %p1251_p8, %p1250_p4 }
  0x6f   : > { %p1253_p6 = pnand %p1252_p13, %p1246_p0 }
  0x71   : > { %1256 = shalt.err (!%p1253_p6)
}
  0x72   : > { %s1257_s16 = scalar_lea.vmem %s1564_s14, 128  ;;  %s1355_s11 = smov [#allocation2]  }
  0x73   : > { %p1258_p10 = scmp.ne.s32.totalorder %s1564_s14, %s1257_s16  ;;  %s1262_s12 = sshll.u32 %s1355_s11, 4  ;;  %s1263_s12 = int_to_ptr.vmem [resolvable:$false] %s1262_s12 }
  0x74   : > { %s1264_s17 = scalar_lea.vmem %s1263_s12, 256  ;;  %p1265_p12 = scmp.lt.s32.totalorder %s1564_s14, %s1263_s12 }
  0x75   : > { %p1260_p3 = pnand %p1258_p10, %p1244_p9  ;;  %p1266_p1 = scmp.lt.s32.totalorder %s1264_s17, %s1257_s16 }
  0x77   : > { %p1261_p7 = pneg %p1260_p3  ;;  %p1267_p2 = por %p1266_p1, %p1265_p12 }
  0x79   : > { %p1268_p4 = pnand %p1267_p2, %p1261_p7 }
  0x7b   : > { %1271 = shalt.err (!%p1268_p4)
}
  0x7c   : > { %1073 = dma.hbm_to_vmem [thread:$0]  (!%p1560_p11), %s1558_s19, 128, %s1564_s14, %s1566_s8, %s1772_s10, %s1772_s10, %s1771_s29  }
  0x7d   : > { %p1776_p9 = scmp.ne.s32.totalorder %s1767_s9, 0 }
  0x7e   : > { %s1600_s20 = sand.u32 (!%p1776_p9), 1, %s1338_s25   ;;  %p1777_p0 = scmp.ne.s32.totalorder (!%p1776_p9), %s1764_s30, 0 }
  0x7f   : > { %292 = sbr.rel (%p1776_p9) target bundleno = 711 (0x2c7), region = 48  ;;  %s949_s18 = sshll.u32 (!%p1776_p9), %s1600_s20, 3 }
  0x80   : > { %s295_s22 = scalar_lea.sflag (!%p1776_p9), [#allocation3], %s1600_s20  ;;  %s1604_s23 = scalar_lea.vmem (!%p1776_p9), [#allocation2], %s949_s18 }
  0x86   : > { %1317 = dma.done.wait (%p1777_p0), %s295_s22, 128  }
  0x87   : > { %1319 = vsyncadd (%p1777_p0), %s295_s22, 4294967168  ;;  %p1778_p11 = scmp.eq.s32.totalorder %s1422_s28, 0 }
  0x89   : > { %1321 = dma.done.wait (%p1778_p11), [#allocation6], 1280   ;;  %p1779_p8 = pmov %p1778_p11 }
  0x8b   : > { %1323 = vsyncadd (%p1779_p8), [#allocation6], 4294966016  ;;  %p1780_p13 = pmov %p1779_p8 }
  0x8c   : > { %p1781_p6 = pmov %p1779_p8 }
  0x8d   : > { %1325 = dma.done.wait (%p1780_p13), [#allocation9], 1024  }
  0x8e   : > { %1327 = vsyncadd (%p1781_p6), [#allocation9], 4294966272  ;;  %v1356_v0 = vmov 0.0   ;;  %vm1357_vm0 = vmmov 0   ;;  %v1129_v1 = vld [vmem:[#allocation5] sm:$0xff]   ;;  %v1130_v2 = vld [vmem:[#allocation5 + $0x8] sm:$0xff]   ;;  %v496_v47 = vlaneseq }
  0x8f   : > { %1004 = vmatprep.subr.bf16.mxu0 %v1356_v0  ;;  %1020 = vmatprep.mubr.msk.bf16.mxu0 %vm1357_vm0, %v1356_v0  ;;  %v1131_v3 = vld [vmem:[#allocation5 + $0x10] sm:$0xff]   ;;  %v1132_v4 = vld [vmem:[#allocation5 + $0x18] sm:$0xff]   ;;  %v1133_v5 = vld [vmem:[#allocation5 + $0x20] sm:$0xff]   ;;  %vm537_vm5 = vcmask 1040384   ;;  %vm550_vm6 = vcmask 1041408   ;;  %vm564_vm7 = vcmask 1043456  }
  0x90   : > { %1024 = vmatprep.subr.bf16.mxu1 %v1356_v0  ;;  %1040 = vmatprep.mubr.msk.bf16.mxu1 %vm1357_vm0, %v1356_v0  ;;  %v1134_v6 = vld [vmem:[#allocation5 + $0x28] sm:$0xff]   ;;  %v1135_v7 = vld [vmem:[#allocation5 + $0x30] sm:$0xff]   ;;  %v1136_v8 = vld [vmem:[#allocation5 + $0x38] sm:$0xff]   ;;  %v1640_v48 = vshrl.u32 %v496_v47, 7  ;;  %s953_s19 = sshll.u32 %s1600_s20, 4  ;;  %s985_s11 = sshll.u32 %s1422_s28, 8 }
  0x91   : > { %1005 = vmatpush3.bf16.msra.mxu0 %v1129_v1  ;;  %v1137_v9 = vld [vmem:[%s1604_s23] sm:$0xff]   ;;  %v1140_v12 = vld [vmem:[#allocation8 + $0x10] sm:$0xff]   ;;  %v1141_v13 = vld [vmem:[#allocation8 + $0x18] sm:$0xff]   ;;  %s340_s8 = scalar_lea.vmem [#allocation10], %s953_s19  ;;  %s1703_s18 = scalar_lea.hbm %s1754_s7, %s985_s11 }
  0x92   : > { %1006 = vmatprep.subr.bf16.mxu0 %v1356_v0  ;;  %v1138_v10 = vld [vmem:[#allocation8] sm:$0xff]   ;;  %v1139_v11 = vld [vmem:[#allocation8 + $0x8] sm:$0xff]   ;;  %v1144_v16 = vld [vmem:[#allocation8 + $0x30] sm:$0xff]   ;;  %v498_v49 = vadd.s32 8, %v1640_v48  ;;  %v503_v54 = vand.u32 3, %v1640_v48  ;;  %v626_v58 = vsub.s32 4, %v1640_v48 }
  0x93   : > { %1025 = vmatpush3.bf16.msra.mxu1 %v1138_v10  ;;  %v1142_v14 = vld [vmem:[#allocation8 + $0x20] sm:$0xff]   ;;  %v1143_v15 = vld [vmem:[#allocation8 + $0x28] sm:$0xff]   ;;  %v1145_v17 = vld [vmem:[#allocation8 + $0x38] sm:$0xff]   ;;  %v618_v60 = vsub.s32 1, %v1640_v48  ;;  %v666_v47 = vsub.s32 2, %v1640_v48  ;;  %s837_s16 = sshll.u32 %s340_s8, 4  ;;  %s1698_s16 = int_to_ptr.vmem [resolvable:$true] %s837_s16 }
  0x94   : > { %1026 = vmatprep.subr.bf16.mxu1 %v1356_v0  ;;  %v954_v18 = vld [vmem:[%s1749_s2] ss:$0 sm:$0xff]  ;;  %v510_v55 = vand.u32 3, %v498_v49  ;;  %vm529_vm1 = vcmp.lt.s32.totalorder %v503_v54, 3  ;;  %vm523_vm3 = vcmp.gt.s32.totalorder %v503_v54, 0  ;;  %v1647_v59 = vld [vmem:[#allocation7] sm:$0xff] }
  0x95   : > { %1007 = vmatpush3.bf16.msra.mxu0 %v1130_v2  ;;  %v966_v56 = vsel %vm529_vm1, 1.0, %v1356_v0  ;;  %s824_s22 = scalar_lea.sflag [#allocation4], %s1600_s20  ;;  %s1272_s28 = scalar_lea.vmem %s1698_s16, 256 }
  0x96   : > { %1008 = vmatprep.subr.bf16.mxu0 %v1356_v0  ;;  %vm530_vm2 = vcmp.lt.s32.totalorder %v510_v55, 3  ;;  %v551_v62 = vrot.slane %v966_v56, 6  ;;  %vm524_vm4 = vcmp.gt.s32.totalorder %v510_v55, 0  ;;  %p1273_p10 = scmp.ne.s32.totalorder %s1698_s16, %s1272_s28  ;;  %s1358_s23 = smov [#allocation10]  }
  0x97   : > { %1027 = vmatpush3.bf16.msra.mxu1 %v1139_v11  ;;  %v967_v57 = vsel %vm530_vm2, 1.0, %v1356_v0  ;;  %v965_v10 = vsel %vm524_vm4, 1.0, %v1356_v0  ;;  %s1276_s30 = sshll.u32 %s1358_s23, 4  ;;  %s1277_s30 = int_to_ptr.vmem [resolvable:$false] %s1276_s30 }
  0x98   : > { %1028 = vmatprep.subr.bf16.mxu1 %v1356_v0  ;;  %v552_v63 = vrot.slane %v967_v57, 6  ;;  %p1274_p3 = pnand %p1273_p10, %p1549_p5  ;;  %s1278_s9 = scalar_lea.vmem %s1277_s30, 512 }
  0x99   : > { %1009 = vmatpush3.bf16.msra.mxu0 %v1131_v3  ;;  %v964_v3 = vsel %vm523_vm3, 1.0, %v1356_v0  ;;  %p1279_p12 = scmp.lt.s32.totalorder %s1698_s16, %s1277_s30  ;;  %p1280_p1 = scmp.lt.s32.totalorder %s1278_s9, %s1272_s28 }
  0x9a   : > { %1010 = vmatprep.subr.bf16.mxu0 %v1356_v0  ;;  %v553_v11 = vsel %vm550_vm6, %v551_v62, %v552_v63  ;;  %p1275_p7 = pneg %p1274_p3 }
  0x9b   : > { %1029 = vmatpush3.bf16.msra.mxu1 %v1140_v12  ;;  %v575_v12 = vsub.s32 0, %v1640_v48  ;;  %p1281_p2 = por %p1280_p1, %p1279_p12 }
  0x9c   : > { %1030 = vmatprep.subr.bf16.mxu1 %v1356_v0 }
  0x9d   : > { %1011 = vmatpush3.bf16.msra.mxu0 %v1132_v4  ;;  %v583_v4 = vsub.s32 3, %v1640_v48  ;;  %p1282_p4 = pnand %p1281_p2, %p1275_p7 }
  0x9e   : > { %1012 = vmatprep.subr.bf16.mxu0 %v1356_v0 }
  0x9f   : > { %1031 = vmatpush3.bf16.msra.mxu1 %v1141_v13  ;;  %v645_v13 = vsub.s32 7, %v1640_v48 }
  0xa0   : > { %1032 = vmatprep.subr.bf16.mxu1 %v1356_v0 }
  0xa1   : > { %1013 = vmatpush3.bf16.msra.mxu0 %v1133_v5  ;;  %v627_v5 = vrot.slane %v1647_v59, %v626_v58 }
  0xa2   : > { %1014 = vmatprep.subr.bf16.mxu0 %v1356_v0 }
  0xa3   : > { %1033 = vmatpush3.bf16.msra.mxu1 %v1142_v14 }
  0xa4   : > { %1034 = vmatprep.subr.bf16.mxu1 %v1356_v0 }
  0xa5   : > { %1015 = vmatpush3.bf16.msra.mxu0 %v1134_v6 }
  0xa6   : > { %1016 = vmatprep.subr.bf16.mxu0 %v1356_v0 }
  0xa7   : > { %1035 = vmatpush3.bf16.msra.mxu1 %v1143_v15 }
  0xa8   : > { %1036 = vmatprep.subr.bf16.mxu1 %v1356_v0 }
  0xa9   : > { %1017 = vmatpush3.bf16.msra.mxu0 %v1135_v7 }
  0xaa   : > { %1018 = vmatprep.subr.bf16.mxu0 %v1356_v0 }
  0xab   : > { %1037 = vmatpush3.bf16.msra.mxu1 %v1144_v16 }
  0xac   : > { %1038 = vmatprep.subr.bf16.mxu1 %v1356_v0 }
  0xad   : > { %1019 = vmatpush3.bf16.msra.mxu0 %v1136_v8 }
  0xaf   : > { %1039 = vmatpush3.bf16.msra.mxu1 %v1145_v17 }
  0xb0   : > { %1021 = vmatmul.mubr.bf16.vlgmr.msra.gmra.mrb[0].mxu0 %v1137_v9  ;;  %v1654_v9 = vrot.slane %v1647_v59, %v618_v60 }
 0x183   : > { %v457_v19 = vpop.f32.mrb[0].mxu0 }
 0x184   : > { %v458_v20 = vadd.f32 %v954_v18, %v457_v19  ;;  %v1022_v21 = vpop.f32.mrb[1].mxu0  ;;  %v584_v19 = vrot.slane %v1647_v59, %v583_v4 }
 0x185   : > { %v460_v22 = vpop.f32.mrb[2].mxu0 }
 0x186   : > { %v466_v23 = vmul.f32 0.044715, %v458_v20  ;;  %v461_v24 = vadd.f32 %v954_v18, %v460_v22  ;;  %v1023_v25 = vpop.f32.mrb[3].mxu0  ;;  %v464_v36 = vmul.f32 0.5, %v458_v20 }
 0x188   : > { %v468_v26 = vmul.f32 %v466_v23, %v458_v20  ;;  %v467_v27 = vmul.f32 0.044715, %v461_v24  ;;  %v465_v40 = vmul.f32 0.5, %v461_v24 }
 0x18a   : > { %v470_v28 = vmul.f32 %v468_v26, %v458_v20  ;;  %v469_v29 = vmul.f32 %v467_v27, %v461_v24 }
 0x18c   : > { %v472_v30 = vadd.f32 %v470_v28, %v458_v20  ;;  %v471_v31 = vmul.f32 %v469_v29, %v461_v24  ;;  %v602_v20 = vsub.s32 6, %v1640_v48  ;;  %v576_v29 = vrot.slane %v1647_v59, %v575_v12 }
 0x18e   : > { %v474_v32 = vmul.f32 0.7978846, %v472_v30  ;;  %v473_v33 = vadd.f32 %v471_v31, %v461_v24 }
 0x190   : > { %1146 = vtanh.f32 %v474_v32  ;;  %v475_v34 = vmul.f32 0.7978846, %v473_v33  ;;  %v674_v32 = vsub.s32 5, %v1640_v48 }
 0x192   : > { %1148 = vtanh.f32 %v475_v34  ;;  %v675_v49 = vrot.slane %v1647_v59, %v674_v32 }
 0x19a   : > { %v1147_v35 = vpop.eup %1146 }
 0x19b   : > { %v478_v37 = vadd.f32 1.0, %v1147_v35 }
 0x19c   : > { %v1149_v38 = vpop.eup %1148 }
 0x19d   : > { %v480_v39 = vmul.f32 %v478_v37, %v464_v36  ;;  %v479_v41 = vadd.f32 1.0, %v1149_v38  ;;  %v603_v36 = vrot.slane %v1647_v59, %v602_v20 }
 0x19f   : > { %v482_v42 = vsub.f32 0.0, %v480_v39  ;;  %v481_v43 = vmul.f32 %v479_v41, %v465_v40 }
 0x1a1   : > { %v484_v44 = vmul.f32 1.442695, %v482_v42  ;;  %v483_v45 = vsub.f32 0.0, %v481_v43 }
 0x1a3   : > { %1150 = vpow2.f32 %v484_v44  ;;  %v486_v46 = vmul.f32 1.442695, %v483_v45 }
 0x1a5   : > { %1152 = vpow2.f32 %v486_v46 }
 0x1ad   : > { %v1151_v50 = vpop.eup %1150 }
 0x1ae   : > { %v488_v51 = vadd.f32 1.0, %v1151_v50 }
 0x1af   : > { %v1153_v52 = vpop.eup %1152 }
 0x1b0   : > { %1154 = vrcp.f32 %v488_v51  ;;  %v489_v53 = vadd.f32 1.0, %v1153_v52 }
 0x1b2   : > { %1156 = vrcp.f32 %v489_v53 }
 0x1ba   : > { %v1155_v61 = vpop.eup %1154 }
 0x1bb   : > { %v494_v1 = vmul.f32 %v1155_v61, %v480_v39 }
 0x1bc   : > { %v1157_v2 = vpop.eup %1156 }
 0x1bd   : > { %v538_v6 = vrot.slane %v494_v1, 7  ;;  %v608_v7 = vrot.slane %v494_v1, 4  ;;  %v495_v8 = vmul.f32 %v1157_v2, %v481_v43 }
 0x1bf   : > { %v539_v14 = vrot.slane %v495_v8, 7  ;;  %v544_v15 = vsel %vm537_vm5, 0.0, %v538_v6  ;;  %v609_v16 = vrot.slane %v495_v8, 4  ;;  %v614_v17 = vsel %vm564_vm7, 0.0, %v608_v7 }
 0x1c0   : > { %v546_v18 = vmul.f32 %v964_v3, %v544_v15  ;;  %v628_v21 = vmul.f32 %v627_v5, %v614_v17  ;;  %v557_v26 = vmul.f32 %v551_v62, %v544_v15  ;;  %v646_v8 = vrot.slane %v1647_v59, %v645_v13 }
 0x1c1   : > { %v540_v0 = vsel %vm537_vm5, %v538_v6, %v539_v14  ;;  %v545_v22 = vsel %vm537_vm5, %v539_v14, 0.0  ;;  %v610_v23 = vsel %vm564_vm7, %v608_v7, %v609_v16  ;;  %v615_v24 = vsel %vm564_vm7, %v609_v16, 0.0 }
 0x1c2   : > { %v547_v25 = vmul.f32 %v965_v10, %v540_v0  ;;  %v558_v27 = vmul.f32 %v553_v11, %v540_v0  ;;  %v565_v28 = vrot.slane %v546_v18, 4  ;;  %v629_v30 = vmul.f32 %v627_v5, %v610_v23 }
 0x1c3   : > { %v630_v31 = vmul.f32 %v627_v5, %v615_v24  ;;  %v559_v33 = vmul.f32 %v552_v63, %v545_v22  ;;  %v634_v38 = vrot.slane %v628_v21, 4  ;;  %v654_v43 = vrot.slane %v557_v26, 6 }
 0x1c4   : > { %v566_v34 = vrot.slane %v547_v25, 4  ;;  %v571_v35 = vsel %vm564_vm7, 0.0, %v565_v28  ;;  %v635_v39 = vrot.slane %v629_v30, 4  ;;  %v655_v44 = vrot.slane %v558_v27, 6 }
 0x1c5   : > { %v585_v37 = vmul.f32 %v584_v19, %v571_v35  ;;  %v637_v40 = vrot.slane %v630_v31, 4  ;;  %v577_v50 = vmul.f32 %v576_v29, %v571_v35  ;;  %v657_v57 = vrot.slane %v559_v33, 6 }
 0x1c6   : > { %v567_v41 = vsel %vm564_vm7, %v565_v28, %v566_v34  ;;  %v572_v42 = vsel %vm564_vm7, %v566_v34, 0.0  ;;  %v636_v52 = vsel %vm564_vm7, %v634_v38, %v635_v39  ;;  %v656_v56 = vsel %vm550_vm6, %v654_v43, %v655_v44 }
 0x1c7   : > { %v586_v45 = vmul.f32 %v584_v19, %v567_v41  ;;  %v587_v46 = vmul.f32 %v584_v19, %v572_v42  ;;  %v591_v51 = vrot.slane %v585_v37, 4  ;;  %v638_v53 = vsel %vm564_vm7, %v635_v39, %v637_v40  ;;  %v970_v40 = vld [vmem:[%s1753_s6] ss:$0 sm:$0xff] }
 0x1c8   : > { %v578_v58 = vmul.f32 %v576_v29, %v567_v41  ;;  %v604_v60 = vmul.f32 %v603_v36, %v567_v41  ;;  %v662_v61 = vsel %vm564_vm7, 0.0, %v654_v43  ;;  %v677_v62 = vmul.f32 %v675_v49, %v656_v56 }
 0x1c9   : > { %v592_v54 = vrot.slane %v586_v45, 4  ;;  %v594_v55 = vrot.slane %v587_v46, 4  ;;  %v605_v1 = vmul.f32 %v603_v36, %v572_v42  ;;  %v658_v2 = vsel %vm550_vm6, %v655_v44, %v657_v57  ;;  %v969_v36 = vld [vmem:[%s1751_s4] ss:$0 sm:$0xff] }
 0x1ca   : > { %v663_v5 = vsel %vm564_vm7, %v658_v2, 0.0  ;;  %v676_v6 = vmul.f32 %v675_v49, %v662_v61  ;;  %v620_v7 = vmul.f32 %v1654_v9, %v614_v17  ;;  %v683_v11 = vrot.slane %v677_v62, 4 }
 0x1cb   : > { %v593_v48 = vsel %vm564_vm7, %v591_v51, %v592_v54  ;;  %v595_v63 = vsel %vm564_vm7, %v592_v54, %v594_v55  ;;  %v678_v10 = vmul.f32 %v675_v49, %v663_v5  ;;  %v621_v15 = vmul.f32 %v1654_v9, %v610_v23  ;;  %v968_v9 = vld [vmem:[#allocation7 + $0x8] ss:$0 sm:$0xff] }
 0x1cc   : > { %v598_v3 = vadd.f32 %v593_v48, %v577_v50  ;;  %v599_v4 = vadd.f32 %v595_v63, %v578_v58  ;;  %v682_v16 = vrot.slane %v676_v6, 4  ;;  %v667_v21 = vrot.slane %v1647_v59, %v666_v47 }
 0x1cd   : > { %v685_v18 = vrot.slane %v678_v10, 4  ;;  %v647_v26 = vmul.f32 %v646_v8, %v610_v23  ;;  %v648_v13 = vmul.f32 %v646_v8, %v615_v24  ;;  %v695_v59 = vmul.f32 %v968_v9, %v656_v56 }
 0x1ce   : > { %v606_v12 = vadd.f32 %v604_v60, %v598_v3  ;;  %v607_v14 = vadd.f32 %v605_v1, %v599_v4  ;;  %v684_v0 = vsel %vm564_vm7, %v682_v16, %v683_v11  ;;  %v668_v29 = vmul.f32 %v667_v21, %v662_v61 }
 0x1cf   : > { %v686_v22 = vsel %vm564_vm7, %v683_v11, %v685_v18  ;;  %v669_v30 = vmul.f32 %v667_v21, %v656_v56  ;;  %v696_v35 = vmul.f32 %v968_v9, %v663_v5 }
 0x1d0   : > { %v622_v19 = vadd.f32 %v620_v7, %v606_v12  ;;  %v623_v20 = vadd.f32 %v621_v15, %v607_v14 }
 0x1d2   : > { %v641_v25 = vadd.f32 %v636_v52, %v622_v19  ;;  %v642_v17 = vadd.f32 %v638_v53, %v623_v20 }
 0x1d4   : > { %v649_v27 = vadd.f32 %v647_v26, %v641_v25  ;;  %v650_v28 = vadd.f32 %v648_v13, %v642_v17 }
 0x1d6   : > { %v670_v31 = vadd.f32 %v668_v29, %v649_v27  ;;  %v671_v32 = vadd.f32 %v669_v30, %v650_v28 }
 0x1d8   : > { %v689_v33 = vadd.f32 %v684_v0, %v670_v31  ;;  %v690_v34 = vadd.f32 %v686_v22, %v671_v32 }
 0x1da   : > { %v697_v37 = vadd.f32 %v695_v59, %v689_v33  ;;  %v698_v23 = vadd.f32 %v696_v35, %v690_v34 }
 0x1dc   : > { %v706_v24 = vadd.f32 %v969_v36, %v697_v37  ;;  %v707_v38 = vadd.f32 %v969_v36, %v698_v23 }
 0x1de   : > { %v708_v39 = vpack.c.bf16 %v707_v38, %v706_v24 }
 0x1e0   : > { %1041 = vmatmul.mubr.bf16.vlgmr.msra.gmra.mrb[0].mxu1 %v708_v39 }
 0x2b3   : > { %v814_v41 = vpop.f32.mrb[0].mxu1 }
 0x2b4   : > { %v815_v42 = vadd.f32 %v970_v40, %v814_v41  ;;  %v1042_v43 = vpop.f32.mrb[1].mxu1 }
 0x2b5   : > { %v817_v44 = vpop.f32.mrb[2].mxu1 }
 0x2b6   : > { %821 = vst [vmem:[%s340_s8] sm:$0xff] %v815_v42  ;;  %v818_v45 = vadd.f32 %v970_v40, %v817_v44  ;;  %v1043_v46 = vpop.f32.mrb[3].mxu1 }
 0x2b8   : > { %822 = vst [vmem:[%s340_s8 + $0x8] sm:$0xff] %v818_v45 }
 0x2b9   : > { %1285 = shalt.err (!%p1282_p4)
}
 0x2ba   : > { %s1286_s29 = scalar_lea.hbm %s1703_s18, 256  ;;  %s1290_s14 = scalar_lea.hbm %s1754_s7, 512 }
 0x2bb   : > { %p1287_p9 = scmp.ne.s32.totalorder %s1703_s18, %s1286_s29  ;;  %p1291_p8 = scmp.lt.u32.totalorder %s1703_s18, %s1754_s7 }
 0x2bc   : > { %p1292_p13 = scmp.lt.u32.totalorder %s1290_s14, %s1286_s29  ;;  %p1294_p10 = scmp.lt.u32.totalorder %s1286_s29, %s1703_s18 }
 0x2bd   : > { %p1288_p0 = pnand %p1287_p9, %p1549_p5 }
 0x2be   : > { %p1293_p6 = por %p1292_p13, %p1291_p8 }
 0x2bf   : > { %p1289_p11 = pneg %p1288_p0 }
 0x2c0   : > { %p1295_p3 = por %p1294_p10, %p1293_p6 }
 0x2c2   : > { %p1296_p7 = pnand %p1295_p3, %p1289_p11 }
 0x2c4   : > { %1299 = shalt.err (!%p1296_p7)
}
 0x2c5   : > { %s1359_s11 = smov 128   ;;  %s1360_s12 = smov 8  }
 0x2c6   : > { %1058 = dma.vmem_to_hbm [thread:$0]  (%p1549_p5), %s1698_s16, 256, %s1703_s18, %s824_s22, %s1359_s11, %s1359_s11, %s1360_s12  }
 0x2c7 PF: > { %s1782_s17 = sld [smem:[#allocation15_spill]]  ;;  %s852_s28 = sand.u32 1, %s1334_s24  }
 0x2c8   : > { %p1784_p1 = scmp.ge.s32.totalorder %s1346_s27, 2  ;;  %s853_s23 = scalar_lea.sflag [#allocation4], %s852_s28 }
 0x2cd   : > { %p1783_p12 = scmp.ne.s32.totalorder %s1782_s17, 0 }
 0x2cf   : > { %p1075_p2 = pnand %p1784_p1, %p1783_p12 }
 0x2d1   : > { %1329 = dma.done.wait (!%p1075_p2), %s853_s23, 256  }
 0x2d2   : > { %1331 = vsyncadd (!%p1075_p2), %s853_s23, 4294967040  ;;  %p22_p4 = scmp.ge.s32.totalorder %s1514_s21, 4   ;;  %s1785_s24 = smov %s1338_s25 }
 0x2d3   : > { %s1786_s25 = smov %s1342_s26  ;;  %s1787_s26 = smov %s1545_s13 }
 0x2d4   : > { %s1788_s27 = smov %s1514_s21  ;;  %24 = sbr.rel (!%p22_p4) target bundleno = 9 (0x9), region = 105 }
 0x2db   :  { %858 = vsyncpa [#allocation3], 1 }
 0x2dc   :  { %860 = vsyncpa [#allocation3 + $0x1], 1 }
 0x2dd   :  { %861 = vsyncpa [#allocation6], 1 }
 0x2de   :  { %862 = vsyncpa [#allocation9], 1 }
 0x2df   :  { %863 = vsyncpa [#allocation4], 1 }
 0x2e0   :  { %865 = vsyncpa [#allocation4 + $0x1], 1 }

</bundles_post_ra>
